<compile_context>
chip_gen: v6e
topology: v6e:2x2x1
jax: 0.10.0
libtpu: 0.0.40
codegen_flags: <defaults>
</compile_context>

<pallas_src>
import jax
import jax.numpy as jnp
from jax.experimental import pallas as pl
from jax.experimental.pallas import tpu as pltpu

# ---------------- configuration (consistent with the module) ---------------------
BATCH = 128          # PyTorch script uses BATCH_SIZE = 128 (FourierLayer takes batch_size)
NOISE_DIM = 20       # implied by Linear(10 + 20, 128)
EMB_DIM = 10         # nn.Embedding(101, 10)
NUM_LABELS = 101
LABELS_PAD = 128     # one-hot width padded to a full lane group (rows 101..127 are zero)
NOISE_PAD = 128      # noise padded to a full lane group (cols 20..127 are zero)
PACKED_IN = LABELS_PAD + NOISE_PAD   # 256 : first-layer contraction depth
HIDDEN = 128
CUT_DFS = 8          # -> final Linear outputs 2*CUT_DFS - 1 = 15 Fourier coefficients
COEFF_DIM = 2 * CUT_DFS - 1
SIGNAL_LEN = 64      # length of the synthesized signal produced by the FourierLayer
PADDED_LEN = ((SIGNAL_LEN + 127) // 128) * 128   # lane-dense output width (=128)
# TODO(synk): the FourierLayer class definition is not included in the provided source;
# we implement the standard interpretation (DC + unnormalized cos/sin harmonics over
# SIGNAL_LEN samples) as a matmul against a constant basis (folded into the last Linear).


# ---------------------------- Pallas kernel --------------------------------------
def _generator_kernel(labels_ref, noisep_ref,
                      w1s_ref,
                      w2_ref, b2_ref,
                      w3_ref, b3_ref,
                      w4_ref, b4_ref,
                      w5b_ref, b5b_ref,
                      out_ref):
    """Fully fused generator forward for the whole batch (single grid step).

    labels_ref: (B, 1)    int32   raw label ids
    noisep_ref: (B, 128)  bf16    noise zero-padded to 128 lanes (pre-cast in wrapper)
    w1s_ref   : (256,128) bf16    [ E @ W1[:10] + b1 (101 rows, zero-padded to 128) ;
                                    W1[10:] (20 rows, zero-padded to 128) ]
    w2..w4    : (128,128) bf16    hidden Linear weights (stored (in,out))
    b2..b4    : (1, 128)  f32     hidden biases
    w5b_ref   : (128,128) bf16    W5 @ fourier_basis (basis zero-padded to 128 lanes)
    b5b_ref   : (1, 128)  f32     b5 @ fourier_basis (padded)
    out_ref   : (B, 128)  f32     padded signals; wrapper slices to SIGNAL_LEN
    """
    f32 = jnp.float32
    bf16 = jnp.bfloat16

    def leaky(v):                      # LeakyReLU(0.2) in f32 on the VPU
        return jnp.where(v > 0, v, 0.2 * v)

    # Fused Embedding lookup + concat + first Linear as ONE K=256 matmul:
    #   one_hot(labels,128) selects the (already bias-folded) embedding@W1 row,
    #   the padded-noise half contracts against zero-padded W1[10:].
    labels = labels_ref[...]                                            # (B, 1) int32
    lane = jax.lax.broadcasted_iota(jnp.int32, (labels.shape[0], LABELS_PAD), 1)
    onehot = (lane == labels).astype(bf16)                              # (B, 128)
    x = jnp.concatenate([onehot, noisep_ref[...]], axis=-1)             # (B, 256) bf16

    h = leaky(jnp.dot(x, w1s_ref[...], preferred_element_type=f32))     # b1 folded in
    h = leaky(jnp.dot(h.astype(bf16), w2_ref[...], preferred_element_type=f32) + b2_ref[...])
    h = leaky(jnp.dot(h.astype(bf16), w3_ref[...], preferred_element_type=f32) + b3_ref[...])
    h = leaky(jnp.dot(h.astype(bf16), w4_ref[...], preferred_element_type=f32) + b4_ref[...])
    # Final Linear(128, 15) folded through the constant Fourier basis:
    #   out = (h @ W5 + b5) @ basis == h @ (W5 @ basis) + (b5 @ basis)
    out_ref[...] = (jnp.dot(h.astype(bf16), w5b_ref[...], preferred_element_type=f32)
                    + b5b_ref[...])


def _run_generator_kernel(labels_2d, noise_padded, kp):
    B = noise_padded.shape[0]

    full = lambda i: (0, 0)   # every operand/output is one full block (grid=(1,))

    in_specs = [
        pl.BlockSpec((B, 1), full),                 # labels
        pl.BlockSpec((B, NOISE_PAD), full),         # noise (padded, bf16)
        pl.BlockSpec((PACKED_IN, HIDDEN), full),    # w1s (= [E@W1[:10]+b1 ; W1[10:]] padded)
        pl.BlockSpec((HIDDEN, HIDDEN), full),       # w2
        pl.BlockSpec((1, HIDDEN), full),            # b2
        pl.BlockSpec((HIDDEN, HIDDEN), full),       # w3
        pl.BlockSpec((1, HIDDEN), full),            # b3
        pl.BlockSpec((HIDDEN, HIDDEN), full),       # w4
        pl.BlockSpec((1, HIDDEN), full),            # b4
        pl.BlockSpec((HIDDEN, PADDED_LEN), full),   # w5b (= W5 @ basis_padded)
        pl.BlockSpec((1, PADDED_LEN), full),        # b5b (= b5 @ basis_padded)
    ]
    operands = (labels_2d, noise_padded,
                kp["w1s"],
                kp["w2"], kp["b2"], kp["w3"], kp["b3"], kp["w4"], kp["b4"],
                kp["w5b"], kp["b5b"])

    # Advisory cost hint: tiny (~25 MFLOP / ~300 KB) call — let XLA schedule around it.
    flops = 2 * B * (PACKED_IN * HIDDEN + 3 * HIDDEN * HIDDEN + HIDDEN * PADDED_LEN)
    bytes_accessed = (B * 4 + B * NOISE_PAD * 2
                      + PACKED_IN * HIDDEN * 2
                      + 3 * (HIDDEN * HIDDEN * 2 + HIDDEN * 4)
                      + HIDDEN * PADDED_LEN * 2 + PADDED_LEN * 4
                      + B * PADDED_LEN * 4)

    return pl.pallas_call(
        _generator_kernel,
        out_shape=jax.ShapeDtypeStruct((B, PADDED_LEN), jnp.float32),
        grid_spec=pltpu.PrefetchScalarGridSpec(
            num_scalar_prefetch=0,
            grid=(1,),
            in_specs=in_specs,
            out_specs=pl.BlockSpec((B, PADDED_LEN), full),
        ),
        compiler_params=pltpu.CompilerParams(
            dimension_semantics=("arbitrary",)),
        cost_estimate=pl.CostEstimate(
            flops=flops, transcendentals=0, bytes_accessed=bytes_accessed),
    )(*operands)


# ---------------------------- parameters / glue -----------------------------------
def init_params(key):
    """Deterministic synthetic f32 master parameters (nn.Linear / nn.Embedding init)."""
    ks = jax.random.split(key, 12)

    def lin(kw, kb, fan_in, fan_out):
        bound = 1.0 / jnp.sqrt(fan_in)
        w = jax.random.uniform(kw, (fan_in, fan_out), jnp.float32, -bound, bound)
        b = jax.random.uniform(kb, (1, fan_out), jnp.float32, -bound, bound)
        return w, b

    params = {}
    params["emb"] = jax.random.normal(ks[0], (NUM_LABELS, EMB_DIM), jnp.float32)
    params["w1"], params["b1"] = lin(ks[1], ks[2], EMB_DIM + NOISE_DIM, HIDDEN)
    params["w2"], params["b2"] = lin(ks[3], ks[4], HIDDEN, HIDDEN)
    params["w3"], params["b3"] = lin(ks[5], ks[6], HIDDEN, HIDDEN)
    params["w4"], params["b4"] = lin(ks[7], ks[8], HIDDEN, HIDDEN)
    params["w5"], params["b5"] = lin(ks[9], ks[10], HIDDEN, COEFF_DIM)
    return params


def make_fourier_basis():
    """Basis (COEFF_DIM, SIGNAL_LEN): row 0 = DC, rows 1..K-1 = cos_k, K..2K-2 = sin_k."""
    t = jnp.arange(SIGNAL_LEN, dtype=jnp.float32)
    k = jnp.arange(1, CUT_DFS, dtype=jnp.float32)
    ang = 2.0 * jnp.pi * k[:, None] * t[None, :] / SIGNAL_LEN
    dc = jnp.ones((1, SIGNAL_LEN), jnp.float32)
    return jnp.concatenate([dc, jnp.cos(ang), jnp.sin(ang)], axis=0)


def prepare_kernel_params(params, basis):
    """One-time offline folding + bf16 casts (not part of the per-call hot path)."""
    bf16 = jnp.bfloat16
    basis_p = jnp.pad(basis, ((0, 0), (0, PADDED_LEN - SIGNAL_LEN)))        # lane-dense
    w1 = params["w1"]

    # Embedding @ W1[:10] with b1 folded into every valid label row (one-hot sums to 1),
    # zero-padded to 128 label rows.
    temb = params["emb"] @ w1[:EMB_DIM] + params["b1"]                      # (101, 128)
    temb_p = jnp.pad(temb, ((0, LABELS_PAD - NUM_LABELS), (0, 0)))          # (128, 128)
    # Noise half of W1, zero-padded to 128 input rows (matches lane-padded noise).
    w1n_p = jnp.pad(w1[EMB_DIM:], ((0, NOISE_PAD - NOISE_DIM), (0, 0)))     # (128, 128)
    w1s = jnp.concatenate([temb_p, w1n_p], axis=0).astype(bf16)             # (256, 128)

    return {
        "w1s": w1s,
        "w2": params["w2"].astype(bf16), "b2": params["b2"],
        "w3": params["w3"].astype(bf16), "b3": params["b3"],
        "w4": params["w4"].astype(bf16), "b4": params["b4"],
        "w5b": (params["w5"] @ basis_p).astype(bf16),                       # (128, 128)
        "b5b": params["b5"] @ basis_p,                                      # (1, 128) f32
    }


@jax.jit
def generator_forward(noise, labels, kparams):
    labels_2d = labels.astype(jnp.int32).reshape(-1, 1)
    # Pre-pad + pre-cast noise once in the wrapper (bf16, 128 lanes) — the zero-padded
    # columns contract against zero weight rows, so the result is unchanged.
    noise_padded = jnp.pad(noise, ((0, 0), (0, NOISE_PAD - NOISE_DIM))).astype(jnp.bfloat16)
    out_padded = _run_generator_kernel(labels_2d, noise_padded, kparams)
    return out_padded[:, :SIGNAL_LEN]


def _reference_forward(noise, labels, params, basis):
    """Plain f32 JAX reference matching the PyTorch module (for a sanity check)."""
    def leaky(v):
        return jnp.where(v > 0, v, 0.2 * v)
    emb = jnp.take(params["emb"], labels, axis=0)
    x = jnp.concatenate([emb, noise], axis=-1)
    h = leaky(x @ params["w1"] + params["b1"])
    h = leaky(h @ params["w2"] + params["b2"])
    h = leaky(h @ params["w3"] + params["b3"])
    h = leaky(h @ params["w4"] + params["b4"])
    coeffs = h @ params["w5"] + params["b5"]
    return coeffs @ basis


# ---------------------------------- main -------------------------------------------
if __name__ == "__main__":
    key = jax.random.PRNGKey(0)
    k_par, k_noise, k_lab = jax.random.split(key, 3)

    params = init_params(k_par)
    basis = make_fourier_basis()
    kparams = prepare_kernel_params(params, basis)

    noise = jax.random.normal(k_noise, (BATCH, NOISE_DIM), jnp.float32)
    labels = jax.random.randint(k_lab, (BATCH,), 0, NUM_LABELS, jnp.int32)

    out = generator_forward(noise, labels, kparams)
    out = jax.block_until_ready(out)

    assert out.shape == (BATCH, SIGNAL_LEN), out.shape
    assert bool(jnp.all(jnp.isfinite(out)))

    # Sanity check: fused/folded bf16-weight kernel vs plain f32 reference.
    ref = _reference_forward(noise, labels, params, basis)
    assert bool(jnp.allclose(out, ref, rtol=1e-1, atol=1e-1)), float(jnp.max(jnp.abs(out - ref)))

    print("KERNEL_OK")
</pallas_src>

<mosaic_0001>
module attributes {stable_mosaic.version = 11 : i64} {
  func.func @_generator_kernel(%arg0: i32, %arg1: memref<128x1xi32, #tpu.memory_space<vmem>>, %arg2: memref<128x128xbf16, #tpu.memory_space<vmem>>, %arg3: memref<256x128xbf16, #tpu.memory_space<vmem>>, %arg4: memref<128x128xbf16, #tpu.memory_space<vmem>>, %arg5: memref<1x128xf32, #tpu.memory_space<vmem>>, %arg6: memref<128x128xbf16, #tpu.memory_space<vmem>>, %arg7: memref<1x128xf32, #tpu.memory_space<vmem>>, %arg8: memref<128x128xbf16, #tpu.memory_space<vmem>>, %arg9: memref<1x128xf32, #tpu.memory_space<vmem>>, %arg10: memref<128x128xbf16, #tpu.memory_space<vmem>>, %arg11: memref<1x128xf32, #tpu.memory_space<vmem>>, %arg12: memref<128x128xf32, #tpu.memory_space<vmem>>) attributes {dimension_semantics = [#tpu.dimension_semantics<arbitrary>], iteration_bounds = array<i64: 1>, scalar_prefetch = 0 : i64, scratch_operands = 0 : i64, tpu.core_type = #tpu.core_type<tc>, window_params = [{pipeline_mode = #tpu.pipeline_mode<synchronous>, transform_indices = @transform_0, window_bounds = array<i64: 128, 1>}, {pipeline_mode = #tpu.pipeline_mode<synchronous>, transform_indices = @transform_1, window_bounds = array<i64: 128, 128>}, {pipeline_mode = #tpu.pipeline_mode<synchronous>, transform_indices = @transform_2, window_bounds = array<i64: 256, 128>}, {pipeline_mode = #tpu.pipeline_mode<synchronous>, transform_indices = @transform_3, window_bounds = array<i64: 128, 128>}, {pipeline_mode = #tpu.pipeline_mode<synchronous>, transform_indices = @transform_4, window_bounds = array<i64: 1, 128>}, {pipeline_mode = #tpu.pipeline_mode<synchronous>, transform_indices = @transform_5, window_bounds = array<i64: 128, 128>}, {pipeline_mode = #tpu.pipeline_mode<synchronous>, transform_indices = @transform_6, window_bounds = array<i64: 1, 128>}, {pipeline_mode = #tpu.pipeline_mode<synchronous>, transform_indices = @transform_7, window_bounds = array<i64: 128, 128>}, {pipeline_mode = #tpu.pipeline_mode<synchronous>, transform_indices = @transform_8, window_bounds = array<i64: 1, 128>}, {pipeline_mode = #tpu.pipeline_mode<synchronous>, transform_indices = @transform_9, window_bounds = array<i64: 128, 128>}, {pipeline_mode = #tpu.pipeline_mode<synchronous>, transform_indices = @transform_10, window_bounds = array<i64: 1, 128>}, {pipeline_mode = #tpu.pipeline_mode<synchronous>, transform_indices = @transform_11, window_bounds = array<i64: 128, 128>}]} {
    %c0 = arith.constant 0 : index
    %c0_0 = arith.constant 0 : index
    %0 = vector.load %arg1[%c0, %c0_0] : memref<128x1xi32, #tpu.memory_space<vmem>>, vector<128x1xi32>
    %1 = tpu.iota {dimensions = array<i32: 1>} : vector<128x128xi32>
    %2 = vector.broadcast %0 : vector<128x1xi32> to vector<128x128xi32>
    %3 = arith.cmpi eq, %1, %2 : vector<128x128xi32>
    %4 = arith.extui %3 : vector<128x128xi1> to vector<128x128xi32>
    %5 = arith.sitofp %4 : vector<128x128xi32> to vector<128x128xf32>
    %6 = arith.truncf %5 : vector<128x128xf32> to vector<128x128xbf16>
    %c0_1 = arith.constant 0 : index
    %c0_2 = arith.constant 0 : index
    %7 = vector.load %arg2[%c0_1, %c0_2] : memref<128x128xbf16, #tpu.memory_space<vmem>>, vector<128x128xbf16>
    %8 = tpu.concatenate %6, %7 in 1 : vector<128x128xbf16>, vector<128x128xbf16> -> vector<128x256xbf16>
    %c0_3 = arith.constant 0 : index
    %c0_4 = arith.constant 0 : index
    %9 = vector.load %arg3[%c0_3, %c0_4] : memref<256x128xbf16, #tpu.memory_space<vmem>>, vector<256x128xbf16>
    %cst = arith.constant dense<0.000000e+00> : vector<128x128xf32>
    %10 = tpu.matmul %8, %9, %cst {dimension_numbers = #tpu.dot_dimension_numbers<[1], [0], [0], [1], [0, 0, 1, 1], [], []>} : vector<128x256xbf16>, vector<256x128xbf16>, vector<128x128xf32> -> vector<128x128xf32>
    %cst_5 = arith.constant 0.000000e+00 : f32
    %11 = vector.broadcast %cst_5 : f32 to vector<128x128xf32>
    %12 = arith.cmpf ogt, %10, %11 : vector<128x128xf32>
    %cst_6 = arith.constant 2.000000e-01 : f32
    %13 = vector.broadcast %cst_6 : f32 to vector<128x128xf32>
    %14 = arith.mulf %13, %10 : vector<128x128xf32>
    %15 = arith.select %12, %10, %14 : vector<128x128xi1>, vector<128x128xf32>
    %16 = arith.truncf %15 : vector<128x128xf32> to vector<128x128xbf16>
    %c0_7 = arith.constant 0 : index
    %c0_8 = arith.constant 0 : index
    %17 = vector.load %arg4[%c0_7, %c0_8] : memref<128x128xbf16, #tpu.memory_space<vmem>>, vector<128x128xbf16>
    %cst_9 = arith.constant dense<0.000000e+00> : vector<128x128xf32>
    %18 = tpu.matmul %16, %17, %cst_9 {dimension_numbers = #tpu.dot_dimension_numbers<[1], [0], [0], [1], [0, 0, 1, 1], [], []>} : vector<128x128xbf16>, vector<128x128xbf16>, vector<128x128xf32> -> vector<128x128xf32>
    %c0_10 = arith.constant 0 : index
    %c0_11 = arith.constant 0 : index
    %19 = vector.load %arg5[%c0_10, %c0_11] : memref<1x128xf32, #tpu.memory_space<vmem>>, vector<1x128xf32>
    %20 = vector.broadcast %19 : vector<1x128xf32> to vector<128x128xf32>
    %21 = arith.addf %18, %20 : vector<128x128xf32>
    %cst_12 = arith.constant 0.000000e+00 : f32
    %22 = vector.broadcast %cst_12 : f32 to vector<128x128xf32>
    %23 = arith.cmpf ogt, %21, %22 : vector<128x128xf32>
    %cst_13 = arith.constant 2.000000e-01 : f32
    %24 = vector.broadcast %cst_13 : f32 to vector<128x128xf32>
    %25 = arith.mulf %24, %21 : vector<128x128xf32>
    %26 = arith.select %23, %21, %25 : vector<128x128xi1>, vector<128x128xf32>
    %27 = arith.truncf %26 : vector<128x128xf32> to vector<128x128xbf16>
    %c0_14 = arith.constant 0 : index
    %c0_15 = arith.constant 0 : index
    %28 = vector.load %arg6[%c0_14, %c0_15] : memref<128x128xbf16, #tpu.memory_space<vmem>>, vector<128x128xbf16>
    %cst_16 = arith.constant dense<0.000000e+00> : vector<128x128xf32>
    %29 = tpu.matmul %27, %28, %cst_16 {dimension_numbers = #tpu.dot_dimension_numbers<[1], [0], [0], [1], [0, 0, 1, 1], [], []>} : vector<128x128xbf16>, vector<128x128xbf16>, vector<128x128xf32> -> vector<128x128xf32>
    %c0_17 = arith.constant 0 : index
    %c0_18 = arith.constant 0 : index
    %30 = vector.load %arg7[%c0_17, %c0_18] : memref<1x128xf32, #tpu.memory_space<vmem>>, vector<1x128xf32>
    %31 = vector.broadcast %30 : vector<1x128xf32> to vector<128x128xf32>
    %32 = arith.addf %29, %31 : vector<128x128xf32>
    %cst_19 = arith.constant 0.000000e+00 : f32
    %33 = vector.broadcast %cst_19 : f32 to vector<128x128xf32>
    %34 = arith.cmpf ogt, %32, %33 : vector<128x128xf32>
    %cst_20 = arith.constant 2.000000e-01 : f32
    %35 = vector.broadcast %cst_20 : f32 to vector<128x128xf32>
    %36 = arith.mulf %35, %32 : vector<128x128xf32>
    %37 = arith.select %34, %32, %36 : vector<128x128xi1>, vector<128x128xf32>
    %38 = arith.truncf %37 : vector<128x128xf32> to vector<128x128xbf16>
    %c0_21 = arith.constant 0 : index
    %c0_22 = arith.constant 0 : index
    %39 = vector.load %arg8[%c0_21, %c0_22] : memref<128x128xbf16, #tpu.memory_space<vmem>>, vector<128x128xbf16>
    %cst_23 = arith.constant dense<0.000000e+00> : vector<128x128xf32>
    %40 = tpu.matmul %38, %39, %cst_23 {dimension_numbers = #tpu.dot_dimension_numbers<[1], [0], [0], [1], [0, 0, 1, 1], [], []>} : vector<128x128xbf16>, vector<128x128xbf16>, vector<128x128xf32> -> vector<128x128xf32>
    %c0_24 = arith.constant 0 : index
    %c0_25 = arith.constant 0 : index
    %41 = vector.load %arg9[%c0_24, %c0_25] : memref<1x128xf32, #tpu.memory_space<vmem>>, vector<1x128xf32>
    %42 = vector.broadcast %41 : vector<1x128xf32> to vector<128x128xf32>
    %43 = arith.addf %40, %42 : vector<128x128xf32>
    %cst_26 = arith.constant 0.000000e+00 : f32
    %44 = vector.broadcast %cst_26 : f32 to vector<128x128xf32>
    %45 = arith.cmpf ogt, %43, %44 : vector<128x128xf32>
    %cst_27 = arith.constant 2.000000e-01 : f32
    %46 = vector.broadcast %cst_27 : f32 to vector<128x128xf32>
    %47 = arith.mulf %46, %43 : vector<128x128xf32>
    %48 = arith.select %45, %43, %47 : vector<128x128xi1>, vector<128x128xf32>
    %49 = arith.truncf %48 : vector<128x128xf32> to vector<128x128xbf16>
    %c0_28 = arith.constant 0 : index
    %c0_29 = arith.constant 0 : index
    %50 = vector.load %arg10[%c0_28, %c0_29] : memref<128x128xbf16, #tpu.memory_space<vmem>>, vector<128x128xbf16>
    %cst_30 = arith.constant dense<0.000000e+00> : vector<128x128xf32>
    %51 = tpu.matmul %49, %50, %cst_30 {dimension_numbers = #tpu.dot_dimension_numbers<[1], [0], [0], [1], [0, 0, 1, 1], [], []>} : vector<128x128xbf16>, vector<128x128xbf16>, vector<128x128xf32> -> vector<128x128xf32>
    %c0_31 = arith.constant 0 : index
    %c0_32 = arith.constant 0 : index
    %52 = vector.load %arg11[%c0_31, %c0_32] : memref<1x128xf32, #tpu.memory_space<vmem>>, vector<1x128xf32>
    %53 = vector.broadcast %52 : vector<1x128xf32> to vector<128x128xf32>
    %54 = arith.addf %51, %53 : vector<128x128xf32>
    %c0_33 = arith.constant 0 : index
    %c0_34 = arith.constant 0 : index
    %55 = vector.load %arg12[%c0_33, %c0_34] : memref<128x128xf32, #tpu.memory_space<vmem>>, vector<128x128xf32>
    tpu.vector_store %arg12[%c0_33, %c0_34], %54 {strides = array<i32>} : memref<128x128xf32, #tpu.memory_space<vmem>>, vector<128x128xf32>,
    return
  }
  func.func @transform_0(%arg0: i32) -> (i32, i32) {
    %c0_i32 = arith.constant 0 : i32
    %c0_i32_0 = arith.constant 0 : i32
    %c0_i32_1 = arith.constant 0 : i32
    return %c0_i32, %c0_i32_0 : i32, i32
  }
  func.func @transform_1(%arg0: i32) -> (i32, i32) {
    %c0_i32 = arith.constant 0 : i32
    %c0_i32_0 = arith.constant 0 : i32
    %c0_i32_1 = arith.constant 0 : i32
    return %c0_i32, %c0_i32_0 : i32, i32
  }
  func.func @transform_2(%arg0: i32) -> (i32, i32) {
    %c0_i32 = arith.constant 0 : i32
    %c0_i32_0 = arith.constant 0 : i32
    %c0_i32_1 = arith.constant 0 : i32
    return %c0_i32, %c0_i32_0 : i32, i32
  }
  func.func @transform_3(%arg0: i32) -> (i32, i32) {
    %c0_i32 = arith.constant 0 : i32
    %c0_i32_0 = arith.constant 0 : i32
    %c0_i32_1 = arith.constant 0 : i32
    return %c0_i32, %c0_i32_0 : i32, i32
  }
  func.func @transform_4(%arg0: i32) -> (i32, i32) {
    %c0_i32 = arith.constant 0 : i32
    %c0_i32_0 = arith.constant 0 : i32
    %c0_i32_1 = arith.constant 0 : i32
    return %c0_i32, %c0_i32_0 : i32, i32
  }
  func.func @transform_5(%arg0: i32) -> (i32, i32) {
    %c0_i32 = arith.constant 0 : i32
    %c0_i32_0 = arith.constant 0 : i32
    %c0_i32_1 = arith.constant 0 : i32
    return %c0_i32, %c0_i32_0 : i32, i32
  }
  func.func @transform_6(%arg0: i32) -> (i32, i32) {
    %c0_i32 = arith.constant 0 : i32
    %c0_i32_0 = arith.constant 0 : i32
    %c0_i32_1 = arith.constant 0 : i32
    return %c0_i32, %c0_i32_0 : i32, i32
  }
  func.func @transform_7(%arg0: i32) -> (i32, i32) {
    %c0_i32 = arith.constant 0 : i32
    %c0_i32_0 = arith.constant 0 : i32
    %c0_i32_1 = arith.constant 0 : i32
    return %c0_i32, %c0_i32_0 : i32, i32
  }
  func.func @transform_8(%arg0: i32) -> (i32, i32) {
    %c0_i32 = arith.constant 0 : i32
    %c0_i32_0 = arith.constant 0 : i32
    %c0_i32_1 = arith.constant 0 : i32
    return %c0_i32, %c0_i32_0 : i32, i32
  }
  func.func @transform_9(%arg0: i32) -> (i32, i32) {
    %c0_i32 = arith.constant 0 : i32
    %c0_i32_0 = arith.constant 0 : i32
    %c0_i32_1 = arith.constant 0 : i32
    return %c0_i32, %c0_i32_0 : i32, i32
  }
  func.func @transform_10(%arg0: i32) -> (i32, i32) {
    %c0_i32 = arith.constant 0 : i32
    %c0_i32_0 = arith.constant 0 : i32
    %c0_i32_1 = arith.constant 0 : i32
    return %c0_i32, %c0_i32_0 : i32, i32
  }
  func.func @transform_11(%arg0: i32) -> (i32, i32) {
    %c0_i32 = arith.constant 0 : i32
    %c0_i32_0 = arith.constant 0 : i32
    %c0_i32_1 = arith.constant 0 : i32
    return %c0_i32, %c0_i32_0 : i32, i32
  }
}

</mosaic_0001>

<bundles_post_ra>
// kernel: generator_forward.1
= control target key start
LH: loop header
LB: loop body
LE: loop exit
PB: predicated region body
PF: predicated region fallthrough
CT: control target
= control target key end

     0   :  { %16 = vsyncpa [#allocation3], 0  ;;  %s2240_s0 = inlined_call_operand.vmem [shape: s32[128,1], index: 0, kind: input, shape index: {}]   ;;  %s2241_s1 = inlined_call_operand.vmem [shape: bf16[128,128], index: 1, kind: input, shape index: {}]   ;;  %s2242_s2 = inlined_call_operand.vmem [shape: bf16[256,128], index: 2, kind: input, shape index: {}]   ;;  %s2243_s3 = inlined_call_operand.vmem [shape: bf16[128,128], index: 3, kind: input, shape index: {}]   ;;  %s2244_s4 = inlined_call_operand.vmem [shape: f32[1,128], index: 4, kind: input, shape index: {}]   ;;  %s2245_s5 = inlined_call_operand.vmem [shape: bf16[128,128], index: 5, kind: input, shape index: {}]   ;;  %s2246_s6 = inlined_call_operand.vmem [shape: f32[1,128], index: 6, kind: input, shape index: {}]   ;;  %s2247_s7 = inlined_call_operand.vmem [shape: bf16[128,128], index: 7, kind: input, shape index: {}]   ;;  %s2248_s8 = inlined_call_operand.hbm [shape: f32[1,128], index: 8, kind: input, shape index: {}]   ;;  %s2249_s9 = inlined_call_operand.vmem [shape: bf16[128,128], index: 9, kind: input, shape index: {}]   ;;  %s2250_s10 = inlined_call_operand.hbm [shape: f32[1,128], index: 10, kind: input, shape index: {}]   ;;  %s2251_s11 = inlined_call_operand.vmem [shape: f32[128,128], index: 11, kind: output, shape index: {}]  }
   0x1   :  { %17 = vsyncpa [#allocation5], 0  ;;  %s1846_s17 = smov [#allocation2]   ;;  %s1847_s19 = smov [#allocation4]  }
   0x2   :  { %s40_s18 = sshll.u32 %s1846_s17, 4  ;;  %s52_s20 = sshll.u32 %s1847_s19, 4  ;;  %s41_s18 = int_to_ptr.vmem [resolvable:$true] %s40_s18  ;;  %s53_s20 = int_to_ptr.vmem [resolvable:$true] %s52_s20 }
   0x3   :  { %s1810_s21 = scalar_lea.vmem %s41_s18, 16  ;;  %s1814_s22 = scalar_lea.vmem %s41_s18, 32 }
   0x4   :  { %p1811_p0 = scmp.ne.s32.totalorder %s41_s18, %s1810_s21  ;;  %p1815_p1 = scmp.lt.s32.totalorder %s41_s18, %s41_s18 }
   0x5   :  { %p1816_p2 = scmp.lt.s32.totalorder %s1814_s22, %s1810_s21 }
   0x7   :  { %p1817_p3 = por %p1816_p2, %p1815_p1 }
   0x9   :  { %p1818_p4 = pnand %p1817_p3, %p1811_p0 }
   0xb   :  { %1821 = shalt.err (!%p1818_p4)
}
   0xc   :  { %43 = dma.hbm_to_vmem [thread:$0]  %s2248_s8, 16, %s41_s18, [#allocation3]  }
   0xd   :  { %s1830_s25 = scalar_lea.vmem %s53_s20, 16  ;;  %s1834_s26 = scalar_lea.vmem %s53_s20, 32 }
   0xe   :  { %p1831_p5 = scmp.ne.s32.totalorder %s53_s20, %s1830_s25  ;;  %p1835_p6 = scmp.lt.s32.totalorder %s53_s20, %s53_s20 }
   0xf   :  { %p1836_p7 = scmp.lt.s32.totalorder %s1834_s26, %s1830_s25 }
  0x11   :  { %p1837_p8 = por %p1836_p7, %p1835_p6 }
  0x13   :  { %p1838_p9 = pnand %p1837_p8, %p1831_p5 }
  0x15   :  { %1841 = shalt.err (!%p1838_p9)
}
  0x16   :  { %55 = dma.hbm_to_vmem [thread:$0]  %s2250_s10, 16, %s53_s20, [#allocation5]  }
  0x17   :  { %1842 = dma.done.wait [#allocation3], 16  }
  0x18   :  { %1843 = vsyncadd [#allocation3], 4294967280 }
  0x19   :  { %1844 = dma.done.wait [#allocation5], 16  }
  0x1a   :  { %1845 = vsyncadd [#allocation5], 4294967280  ;;  %v1848_v0 = vmov 0   ;;  %v65_v1 = vld [vmem:[%s2240_s0 + $0x10] sm:$0xff]  ;;  %v63_v2 = vld [vmem:[%s2240_s0] sm:$0xff]  ;;  %v79_v37 = vlaneseq }
  0x1b   :  { %1745 = vset.pattern.permute.xlu1 %v1848_v0  ;;  %1744 = vset.pattern.permute.xlu0 %v1848_v0  ;;  %v66_v3 = vld [vmem:[%s2240_s0 + $0x18] sm:$0xff]  ;;  %v64_v4 = vld [vmem:[%s2240_s0 + $0x8] sm:$0xff]  ;;  %v67_v6 = vld [vmem:[%s2240_s0 + $0x20] sm:$0xff]  ;;  %v1849_v43 = vmov 1.0|1.0  }
  0x1c   :  { %88 = vperm.xlu1 %1745, %v65_v1   ;;  %82 = vperm.xlu0 %1744, %v63_v2   ;;  %v68_v5 = vld [vmem:[%s2240_s0 + $0x28] sm:$0xff]  ;;  %v1746_v7 = vld [vmem:[%s2242_s2 + $0x78] sm:$0xff]   ;;  %v1748_v10 = vld [vmem:[%s2242_s2 + $0x70] sm:$0xff]   ;;  %v80_v39 = vand.u32 127, %v79_v37 }
  0x1d   :  { %v1747_v8 = vld [vmem:[%s2242_s2 + $0x38] sm:$0xff]   ;;  %1484 = vmatprep.subr.bf16.mxu0 %v1746_v7  ;;  %v69_v11 = vld [vmem:[%s2240_s0 + $0x30] sm:$0xff]  ;;  %v1750_v13 = vld [vmem:[%s2242_s2 + $0x68] sm:$0xff]  }
  0x1e   :  { %v70_v9 = vld [vmem:[%s2240_s0 + $0x38] sm:$0xff]  ;;  %1485 = vmatpush3.bf16.msra.mxu0 %v1747_v8  ;;  %v1749_v12 = vld [vmem:[%s2242_s2 + $0x30] sm:$0xff]   ;;  %v72_v14 = vld [vmem:[%s2240_s0 + $0x48] sm:$0xff] }
  0x1f   :  { %1486 = vmatprep.subr.bf16.mxu0 %v1748_v10  ;;  %v71_v15 = vld [vmem:[%s2240_s0 + $0x40] sm:$0xff]  ;;  %v1751_v16 = vld [vmem:[%s2242_s2 + $0x28] sm:$0xff]   ;;  %v74_v18 = vld [vmem:[%s2240_s0 + $0x58] sm:$0xff] }
  0x20   :  { %91 = vperm.xlu1 %1745, %v66_v3   ;;  %85 = vperm.xlu0 %1744, %v64_v4   ;;  %v1752_v17 = vld [vmem:[%s2242_s2 + $0x60] sm:$0xff]   ;;  %v73_v19 = vld [vmem:[%s2240_s0 + $0x50] sm:$0xff]  ;;  %v1754_v21 = vld [vmem:[%s2242_s2 + $0x58] sm:$0xff]  }
  0x21   :  { %v1753_v20 = vld [vmem:[%s2242_s2 + $0x20] sm:$0xff]   ;;  %v76_v22 = vld [vmem:[%s2240_s0 + $0x68] sm:$0xff]  ;;  %v1755_v24 = vld [vmem:[%s2242_s2 + $0x18] sm:$0xff]  }
  0x22   :  { %1487 = vmatpush3.bf16.msra.mxu0 %v1749_v12  ;;  %v75_v23 = vld [vmem:[%s2240_s0 + $0x60] sm:$0xff]  ;;  %v1756_v26 = vld [vmem:[%s2242_s2 + $0x50] sm:$0xff]   ;;  %v78_v27 = vld [vmem:[%s2240_s0 + $0x78] sm:$0xff] }
  0x23   :  { %1488 = vmatprep.subr.bf16.mxu0 %v1750_v13  ;;  %v1762_v25 = vld [vmem:[%s2241_s1] sm:$0xff]   ;;  %v77_v28 = vld [vmem:[%s2240_s0 + $0x70] sm:$0xff]  ;;  %v1758_v30 = vld [vmem:[%s2242_s2 + $0x48] sm:$0xff]  }
  0x24   :  { %97 = vperm.xlu1 %1745, %v68_v5   ;;  %94 = vperm.xlu0 %1744, %v67_v6   ;;  %v1757_v29 = vld [vmem:[%s2242_s2 + $0x10] sm:$0xff]   ;;  %v1759_v31 = vld [vmem:[%s2242_s2 + $0x8] sm:$0xff]   ;;  %v1760_v32 = vld [vmem:[%s2242_s2 + $0x40] sm:$0xff]  }
  0x25   :  { %409 = vmatprep.mubr.bf16.mxu0 %v1762_v25  ;;  %v1761_v33 = vld [vmem:[%s2242_s2] sm:$0xff]   ;;  %v1770_v34 = vld [vmem:[%s2243_s3 + $0x38] sm:$0xff]   ;;  %v1771_v35 = vld [vmem:[%s2243_s3 + $0x30] sm:$0xff]  }
  0x26   :  { %1489 = vmatpush3.bf16.msra.mxu0 %v1751_v16  ;;  %1612 = vmatprep.subr.bf16.mxu1 %v1770_v34  ;;  %v1772_v36 = vld [vmem:[%s2243_s3 + $0x28] sm:$0xff]   ;;  %v1764_v45 = vld [vmem:[%s2241_s1 + $0x10] sm:$0xff]   ;;  %v1765_v48 = vld [vmem:[%s2241_s1 + $0x18] sm:$0xff]  }
  0x27   :  { %1490 = vmatprep.subr.bf16.mxu0 %v1752_v17  ;;  %1613 = vmatpush3.bf16.msra.mxu1 %v1770_v34  ;;  %v1763_v42 = vld [vmem:[%s2241_s1 + $0x8] sm:$0xff]   ;;  %v1766_v51 = vld [vmem:[%s2241_s1 + $0x20] sm:$0xff]   ;;  %v1768_v57 = vld [vmem:[%s2241_s1 + $0x30] sm:$0xff]  }
  0x28   :  { %103 = vperm.xlu1 %1745, %v70_v9   ;;  %100 = vperm.xlu0 %1744, %v69_v11   ;;  %v1767_v54 = vld [vmem:[%s2241_s1 + $0x28] sm:$0xff]   ;;  %v1769_v60 = vld [vmem:[%s2241_s1 + $0x38] sm:$0xff]   ;;  %v1773_v63 = vld [vmem:[%s2243_s3 + $0x20] sm:$0xff]  }
  0x29   :  { %1614 = vmatprep.subr.bf16.mxu1 %v1771_v35  ;;  %v1774_v0 = vld [vmem:[%s2243_s3 + $0x18] sm:$0xff]   ;;  %v1775_v1 = vld [vmem:[%s2243_s3 + $0x10] sm:$0xff]   ;;  %v1776_v2 = vld [vmem:[%s2243_s3 + $0x8] sm:$0xff]  }
  0x2a   :  { %1491 = vmatpush3.bf16.msra.mxu0 %v1753_v20  ;;  %v1777_v3 = vld [vmem:[%s2243_s3] sm:$0xff]   ;;  %v1778_v4 = vld [vmem:[%s2245_s5 + $0x38] sm:$0xff]  }
  0x2b   :  { %1492 = vmatprep.subr.bf16.mxu0 %v1754_v21  ;;  %1615 = vmatpush3.bf16.msra.mxu1 %v1771_v35 }
  0x2c   :  { %109 = vperm.xlu1 %1745, %v72_v14   ;;  %106 = vperm.xlu0 %1744, %v71_v15  }
  0x2d   :  { %1616 = vmatprep.subr.bf16.mxu1 %v1772_v36 }
  0x2e   :  { %1493 = vmatpush3.bf16.msra.mxu0 %v1755_v24 }
  0x2f   :  { %1494 = vmatprep.subr.bf16.mxu0 %v1756_v26  ;;  %1617 = vmatpush3.bf16.msra.mxu1 %v1772_v36  ;;  %v1780_v36 = vld [vmem:[%s2245_s5 + $0x28] sm:$0xff]  }
  0x30   :  { %115 = vperm.xlu1 %1745, %v74_v18   ;;  %112 = vperm.xlu0 %1744, %v73_v19  }
  0x31   :  { %1618 = vmatprep.subr.bf16.mxu1 %v1773_v63 }
  0x32   :  { %1495 = vmatpush3.bf16.msra.mxu0 %v1757_v29 }
  0x33   :  { %1496 = vmatprep.subr.bf16.mxu0 %v1758_v30  ;;  %1619 = vmatpush3.bf16.msra.mxu1 %v1773_v63 }
  0x34   :  { %121 = vperm.xlu1 %1745, %v76_v22   ;;  %118 = vperm.xlu0 %1744, %v75_v23  }
  0x35   :  { %1620 = vmatprep.subr.bf16.mxu1 %v1774_v0 }
  0x36   :  { %1497 = vmatpush3.bf16.msra.mxu0 %v1759_v31  ;;  %v1779_v31 = vld [vmem:[%s2245_s5 + $0x30] sm:$0xff]  }
  0x37   :  { %1498 = vmatprep.subr.bf16.mxu0 %v1760_v32  ;;  %1621 = vmatpush3.bf16.msra.mxu1 %v1774_v0 }
  0x38   :  { %127 = vperm.xlu1 %1745, %v78_v27   ;;  %124 = vperm.xlu0 %1744, %v77_v28  }
  0x39   :  { %1622 = vmatprep.subr.bf16.mxu1 %v1775_v1 }
  0x3a   :  { %1499 = vmatpush3.bf16.msra.mxu0 %v1761_v33 }
  0x3b   :  { %1623 = vmatpush3.bf16.msra.mxu1 %v1775_v1 }
  0x3c   :  { %1624 = vmatprep.subr.bf16.mxu1 %v1776_v2 }
  0x3f   :  { %1625 = vmatpush3.bf16.msra.mxu1 %v1776_v2 }
  0x40   :  { %1626 = vmatprep.subr.bf16.mxu1 %v1777_v3 }
  0x43   :  { %1627 = vmatpush3.bf16.msra.mxu1 %v1777_v3 }
  0x44   :  { %1644 = vmatprep.subr.bf16.mxu1 %v1778_v4 }
  0x97   :  { %v83_v38 = vpop.permute.xlu0 %82  ;;  %v89_v41 = vpop.permute.xlu1 %88 }
  0x98   :  { %vm129_vm1 = vcmp.eq.s32.totalorder %v80_v39, %v83_v38  ;;  %vm131_vm3 = vcmp.eq.s32.totalorder %v80_v39, %v89_v41 }
  0x9b   :  { %v86_v40 = vpop.permute.xlu0 %85  ;;  %v92_v44 = vpop.permute.xlu1 %91 }
  0x9c   :  { %vm130_vm0 = vcmp.eq.s32.totalorder %v80_v39, %v86_v40  ;;  %vm132_vm4 = vcmp.eq.s32.totalorder %v80_v39, %v92_v44  ;;  %v1781_v44 = vld [vmem:[%s2245_s5 + $0x20] sm:$0xff]  }
  0x9d   :  { %vm1432_vm2 = vmpackc.low %vm130_vm0, %vm129_vm1 }
  0x9e   :  { %1433 = vmatmul.mubr.msk.bf16.vlgmr.msra.gmra.mxu0 %vm1432_vm2, %v1849_v43  ;;  %vm1434_vm5 = vmpackc.low %vm132_vm4, %vm131_vm3 }
  0x9f   :  { %417 = vmatprep.mubr.bf16.mxu0 %v1763_v42  ;;  %v98_v46 = vpop.permute.xlu1 %97  ;;  %v95_v47 = vpop.permute.xlu0 %94 }
  0xa0   :  { %vm134_vm6 = vcmp.eq.s32.totalorder %v80_v39, %v98_v46  ;;  %vm133_vm7 = vcmp.eq.s32.totalorder %v80_v39, %v95_v47 }
  0xa1   :  { %vm1436_vm8 = vmpackc.low %vm134_vm6, %vm133_vm7 }
  0xa3   :  { %v104_v49 = vpop.permute.xlu1 %103  ;;  %v101_v50 = vpop.permute.xlu0 %100 }
  0xa4   :  { %vm136_vm9 = vcmp.eq.s32.totalorder %v80_v39, %v104_v49  ;;  %vm135_vm10 = vcmp.eq.s32.totalorder %v80_v39, %v101_v50  ;;  %v1782_v49 = vld [vmem:[%s2245_s5 + $0x18] sm:$0xff]  }
  0xa5   :  { %vm1438_vm11 = vmpackc.low %vm136_vm9, %vm135_vm10 }
  0xa6   :  { %1435 = vmatmul.mubr.msk.bf16.gmra.mxu0 %vm1434_vm5, %v1849_v43 }
  0xa7   :  { %425 = vmatprep.mubr.bf16.mxu0 %v1764_v45  ;;  %v110_v52 = vpop.permute.xlu1 %109  ;;  %v107_v53 = vpop.permute.xlu0 %106 }
  0xa8   :  { %vm138_vm12 = vcmp.eq.s32.totalorder %v80_v39, %v110_v52  ;;  %vm137_vm13 = vcmp.eq.s32.totalorder %v80_v39, %v107_v53 }
  0xa9   :  { %vm1440_vm14 = vmpackc.low %vm138_vm12, %vm137_vm13 }
  0xab   :  { %v116_v55 = vpop.permute.xlu1 %115  ;;  %v113_v56 = vpop.permute.xlu0 %112 }
  0xac   :  { %vm140_vm15 = vcmp.eq.s32.totalorder %v80_v39, %v116_v55  ;;  %vm139_vm0 = vcmp.eq.s32.totalorder %v80_v39, %v113_v56 }
  0xad   :  { %vm1442_vm1 = vmpackc.low %vm140_vm15, %vm139_vm0 }
  0xae   :  { %1437 = vmatmul.mubr.msk.bf16.gmra.mxu0 %vm1436_vm8, %v1849_v43 }
  0xaf   :  { %433 = vmatprep.mubr.bf16.mxu0 %v1765_v48  ;;  %v122_v58 = vpop.permute.xlu1 %121  ;;  %v119_v59 = vpop.permute.xlu0 %118 }
  0xb0   :  { %vm142_vm2 = vcmp.eq.s32.totalorder %v80_v39, %v122_v58  ;;  %vm141_vm3 = vcmp.eq.s32.totalorder %v80_v39, %v119_v59 }
  0xb1   :  { %vm1444_vm4 = vmpackc.low %vm142_vm2, %vm141_vm3 }
  0xb3   :  { %v128_v61 = vpop.permute.xlu1 %127  ;;  %v125_v62 = vpop.permute.xlu0 %124 }
  0xb4   :  { %vm144_vm5 = vcmp.eq.s32.totalorder %v80_v39, %v128_v61  ;;  %vm143_vm6 = vcmp.eq.s32.totalorder %v80_v39, %v125_v62 }
  0xb5   :  { %vm1446_vm7 = vmpackc.low %vm144_vm5, %vm143_vm6 }
  0xb6   :  { %1439 = vmatmul.mubr.msk.bf16.gmra.mxu0 %vm1438_vm11, %v1849_v43 }
  0xb7   :  { %441 = vmatprep.mubr.bf16.mxu0 %v1766_v51 }
  0xbe   :  { %1441 = vmatmul.mubr.msk.bf16.gmra.mxu0 %vm1440_vm14, %v1849_v43 }
  0xbf   :  { %449 = vmatprep.mubr.bf16.mxu0 %v1767_v54 }
  0xc6   :  { %1443 = vmatmul.mubr.msk.bf16.gmra.mxu0 %vm1442_vm1, %v1849_v43 }
  0xc7   :  { %457 = vmatprep.mubr.bf16.mxu0 %v1768_v57 }
  0xce   :  { %1445 = vmatmul.mubr.msk.bf16.gmra.mxu0 %vm1444_vm4, %v1849_v43 }
  0xcf   :  { %465 = vmatprep.mubr.bf16.mxu0 %v1769_v60 }
  0xd6   :  { %1447 = vmatmul.mubr.msk.bf16.gmra.mxu0 %vm1446_vm7, %v1849_v43 }
 0x15e   :  { %v1500_v5 = vpop.f32.mrf.mxu0 }
 0x160   :  { %v1501_v6 = vpop.f32.mrf.mxu0 }
 0x161   :  { %v1502_v7 = vadd.f32 %v1501_v6, %v1500_v5 }
 0x162   :  { %v1503_v8 = vpop.f32.mrf.mxu0 }
 0x163   :  { %v490_v10 = vmul.f32 0.2, %v1502_v7  ;;  %vm474_vm8 = vcmp.gt.f32.partialorder %v1502_v7, 0.0 }
 0x164   :  { %v1504_v9 = vpop.f32.mrf.mxu0 }
 0x165   :  { %v1505_v11 = vadd.f32 %v1504_v9, %v1503_v8  ;;  %v506_v16 = vsel %vm474_vm8, %v1502_v7, %v490_v10 }
 0x166   :  { %v1506_v12 = vpop.f32.mrf.mxu0 }
 0x167   :  { %v491_v13 = vmul.f32 0.2, %v1505_v11  ;;  %vm475_vm9 = vcmp.gt.f32.partialorder %v1505_v11, 0.0 }
 0x168   :  { %v1507_v14 = vpop.f32.mrf.mxu0 }
 0x169   :  { %v1508_v15 = vadd.f32 %v1507_v14, %v1506_v12  ;;  %v507_v17 = vsel %vm475_vm9, %v1505_v11, %v491_v13 }
 0x16a   :  { %v1509_v18 = vpop.f32.mrf.mxu0  ;;  %v522_v19 = vpack.c.bf16 %v507_v17, %v506_v16 }
 0x16b   :  { %v492_v21 = vmul.f32 0.2, %v1508_v15  ;;  %vm476_vm10 = vcmp.gt.f32.partialorder %v1508_v15, 0.0 }
 0x16c   :  { %v1510_v20 = vpop.f32.mrf.mxu0  ;;  %1628 = vmatprep.mubr.bf16.mxu1 %v522_v19 }
 0x16d   :  { %v1511_v22 = vadd.f32 %v1510_v20, %v1509_v18  ;;  %v508_v27 = vsel %vm476_vm10, %v1508_v15, %v492_v21 }
 0x16e   :  { %v1512_v23 = vpop.f32.mrf.mxu0 }
 0x16f   :  { %vm477_vm11 = vcmp.gt.f32.partialorder %v1511_v22, 0.0  ;;  %v493_v24 = vmul.f32 0.2, %v1511_v22 }
 0x170   :  { %v1513_v25 = vpop.f32.mrf.mxu0 }
 0x171   :  { %v1514_v26 = vadd.f32 %v1513_v25, %v1512_v23  ;;  %v509_v28 = vsel %vm477_vm11, %v1511_v22, %v493_v24 }
 0x172   :  { %v1515_v29 = vpop.f32.mrf.mxu0  ;;  %v523_v30 = vpack.c.bf16 %v509_v28, %v508_v27 }
 0x173   :  { %v494_v33 = vmul.f32 0.2, %v1514_v26  ;;  %vm478_vm12 = vcmp.gt.f32.partialorder %v1514_v26, 0.0 }
 0x174   :  { %v1516_v32 = vpop.f32.mrf.mxu0  ;;  %1629 = vmatmul.mubr.bf16.vlgmr.msra.gmra.mxu1 %v523_v30 }
 0x175   :  { %v1517_v34 = vadd.f32 %v1516_v32, %v1515_v29  ;;  %1645 = vmatpush3.bf16.msra.mxu1 %v1778_v4  ;;  %v510_v40 = vsel %vm478_vm12, %v1514_v26, %v494_v33  ;;  %v1783_v33 = vld [vmem:[%s2245_s5 + $0x10] sm:$0xff]  }
 0x176   :  { %v1518_v35 = vpop.f32.mrf.mxu0  ;;  %1646 = vmatprep.subr.bf16.mxu1 %v1779_v31 }
 0x177   :  { %vm479_vm13 = vcmp.gt.f32.partialorder %v1517_v34, 0.0  ;;  %v495_v37 = vmul.f32 0.2, %v1517_v34 }
 0x178   :  { %v1519_v38 = vpop.f32.mrf.mxu0 }
 0x179   :  { %v1520_v39 = vadd.f32 %v1519_v38, %v1518_v35  ;;  %v511_v41 = vsel %vm479_vm13, %v1517_v34, %v495_v37  ;;  %1647 = vmatpush3.bf16.msra.mxu1 %v1779_v31  ;;  %v1784_v34 = vld [vmem:[%s2245_s5 + $0x8] sm:$0xff]   ;;  %v1785_v35 = vld [vmem:[%s2245_s5] sm:$0xff]   ;;  %v1787_v37 = vld [vmem:[%s2247_s7 + $0x30] sm:$0xff]  }
 0x17a   :  { %v1521_v42 = vpop.f32.mrf.mxu0  ;;  %v524_v43 = vpack.c.bf16 %v511_v41, %v510_v40  ;;  %1648 = vmatprep.subr.bf16.mxu1 %v1780_v36  ;;  %v1788_v38 = vld [vmem:[%s2247_s7 + $0x28] sm:$0xff]   ;;  %v1790_v40 = vld [vmem:[%s2247_s7 + $0x18] sm:$0xff]  }
 0x17b   :  { %v496_v46 = vmul.f32 0.2, %v1520_v39  ;;  %vm480_vm14 = vcmp.gt.f32.partialorder %v1520_v39, 0.0 }
 0x17c   :  { %v1522_v45 = vpop.f32.mrf.mxu0  ;;  %1632 = vmatprep.mubr.bf16.mxu1 %v524_v43 }
 0x17d   :  { %v1523_v47 = vadd.f32 %v1522_v45, %v1521_v42  ;;  %1649 = vmatpush3.bf16.msra.mxu1 %v1780_v36  ;;  %v512_v53 = vsel %vm480_vm14, %v1520_v39, %v496_v46  ;;  %v1786_v36 = vld [vmem:[%s2247_s7 + $0x38] sm:$0xff]   ;;  %v1789_v39 = vld [vmem:[%s2247_s7 + $0x20] sm:$0xff]  }
 0x17e   :  { %v1524_v48 = vpop.f32.mrf.mxu0  ;;  %1650 = vmatprep.subr.bf16.mxu1 %v1781_v44  ;;  %1676 = vmatprep.subr.bf16.mxu0 %v1786_v36  ;;  %v2102_v42 = vld [vmem:[%s2244_s4] ss:$0 sm:$0xff] }
 0x17f   :  { %vm481_vm15 = vcmp.gt.f32.partialorder %v1523_v47, 0.0  ;;  %v497_v50 = vmul.f32 0.2, %v1523_v47  ;;  %1677 = vmatpush3.bf16.msra.mxu0 %v1786_v36 }
 0x180   :  { %v1525_v51 = vpop.f32.mrf.mxu0  ;;  %1678 = vmatprep.subr.bf16.mxu0 %v1787_v37 }
 0x181   :  { %v1526_v52 = vadd.f32 %v1525_v51, %v1524_v48  ;;  %v513_v54 = vsel %vm481_vm15, %v1523_v47, %v497_v50  ;;  %1651 = vmatpush3.bf16.msra.mxu1 %v1781_v44 }
 0x182   :  { %v1527_v55 = vpop.f32.mrf.mxu0  ;;  %v525_v56 = vpack.c.bf16 %v513_v54, %v512_v53  ;;  %1652 = vmatprep.subr.bf16.mxu1 %v1782_v49 }
 0x183   :  { %v498_v58 = vmul.f32 0.2, %v1526_v52  ;;  %vm482_vm0 = vcmp.gt.f32.partialorder %v1526_v52, 0.0  ;;  %1679 = vmatpush3.bf16.msra.mxu0 %v1787_v37 }
 0x184   :  { %v1528_v57 = vpop.f32.mrf.mxu0  ;;  %1633 = vmatmul.mubr.bf16.gmra.mxu1 %v525_v56  ;;  %1680 = vmatprep.subr.bf16.mxu0 %v1788_v38 }
 0x185   :  { %v1529_v59 = vadd.f32 %v1528_v57, %v1527_v55  ;;  %1653 = vmatpush3.bf16.msra.mxu1 %v1782_v49  ;;  %v514_v0 = vsel %vm482_vm0, %v1526_v52, %v498_v58 }
 0x186   :  { %v1530_v60 = vpop.f32.mrf.mxu0  ;;  %1654 = vmatprep.subr.bf16.mxu1 %v1783_v33 }
 0x187   :  { %vm483_vm1 = vcmp.gt.f32.partialorder %v1529_v59, 0.0  ;;  %v499_v61 = vmul.f32 0.2, %v1529_v59  ;;  %1681 = vmatpush3.bf16.msra.mxu0 %v1788_v38 }
 0x188   :  { %v1531_v62 = vpop.f32.mrf.mxu0  ;;  %1682 = vmatprep.subr.bf16.mxu0 %v1789_v39 }
 0x189   :  { %v1532_v63 = vadd.f32 %v1531_v62, %v1530_v60  ;;  %v515_v1 = vsel %vm483_vm1, %v1529_v59, %v499_v61  ;;  %1655 = vmatpush3.bf16.msra.mxu1 %v1783_v33 }
 0x18a   :  { %v1533_v2 = vpop.f32.mrf.mxu0  ;;  %v526_v3 = vpack.c.bf16 %v515_v1, %v514_v0  ;;  %1656 = vmatprep.subr.bf16.mxu1 %v1784_v34 }
 0x18b   :  { %v500_v5 = vmul.f32 0.2, %v1532_v63  ;;  %vm484_vm2 = vcmp.gt.f32.partialorder %v1532_v63, 0.0  ;;  %1683 = vmatpush3.bf16.msra.mxu0 %v1789_v39 }
 0x18c   :  { %v1534_v4 = vpop.f32.mrf.mxu0  ;;  %1636 = vmatprep.mubr.bf16.mxu1 %v526_v3  ;;  %1684 = vmatprep.subr.bf16.mxu0 %v1790_v40 }
 0x18d   :  { %v1535_v6 = vadd.f32 %v1534_v4, %v1533_v2  ;;  %v516_v11 = vsel %vm484_vm2, %v1532_v63, %v500_v5  ;;  %1657 = vmatpush3.bf16.msra.mxu1 %v1784_v34 }
 0x18e   :  { %v1536_v7 = vpop.f32.mrf.mxu0  ;;  %1658 = vmatprep.subr.bf16.mxu1 %v1785_v35 }
 0x18f   :  { %vm485_vm3 = vcmp.gt.f32.partialorder %v1535_v6, 0.0  ;;  %v501_v8 = vmul.f32 0.2, %v1535_v6  ;;  %1685 = vmatpush3.bf16.msra.mxu0 %v1790_v40 }
 0x190   :  { %v1537_v9 = vpop.f32.mrf.mxu0 }
 0x191   :  { %v1538_v10 = vadd.f32 %v1537_v9, %v1536_v7  ;;  %v517_v12 = vsel %vm485_vm3, %v1535_v6, %v501_v8  ;;  %1659 = vmatpush3.bf16.msra.mxu1 %v1785_v35 }
 0x192   :  { %v1539_v13 = vpop.f32.mrf.mxu0  ;;  %v527_v14 = vpack.c.bf16 %v517_v12, %v516_v11 }
 0x193   :  { %v502_v16 = vmul.f32 0.2, %v1538_v10  ;;  %vm486_vm4 = vcmp.gt.f32.partialorder %v1538_v10, 0.0 }
 0x194   :  { %v1540_v15 = vpop.f32.mrf.mxu0  ;;  %1637 = vmatmul.mubr.bf16.gmra.mxu1 %v527_v14 }
 0x195   :  { %v1541_v17 = vadd.f32 %v1540_v15, %v1539_v13  ;;  %v518_v22 = vsel %vm486_vm4, %v1538_v10, %v502_v16 }
 0x196   :  { %v1542_v18 = vpop.f32.mrf.mxu0 }
 0x197   :  { %vm487_vm5 = vcmp.gt.f32.partialorder %v1541_v17, 0.0  ;;  %v503_v19 = vmul.f32 0.2, %v1541_v17 }
 0x198   :  { %v1543_v20 = vpop.f32.mrf.mxu0 }
 0x199   :  { %v1544_v21 = vadd.f32 %v1543_v20, %v1542_v18  ;;  %v519_v23 = vsel %vm487_vm5, %v1541_v17, %v503_v19 }
 0x19a   :  { %v1545_v24 = vpop.f32.mrf.mxu0  ;;  %v528_v25 = vpack.c.bf16 %v519_v23, %v518_v22 }
 0x19b   :  { %v504_v27 = vmul.f32 0.2, %v1544_v21  ;;  %vm488_vm6 = vcmp.gt.f32.partialorder %v1544_v21, 0.0 }
 0x19c   :  { %v1546_v26 = vpop.f32.mrf.mxu0  ;;  %1640 = vmatprep.mubr.bf16.mxu1 %v528_v25 }
 0x19d   :  { %v1547_v28 = vadd.f32 %v1546_v26, %v1545_v24  ;;  %v520_v30 = vsel %vm488_vm6, %v1544_v21, %v504_v27 }
 0x19f   :  { %vm489_vm7 = vcmp.gt.f32.partialorder %v1547_v28, 0.0  ;;  %v505_v29 = vmul.f32 0.2, %v1547_v28 }
 0x1a1   :  { %v521_v31 = vsel %vm489_vm7, %v1547_v28, %v505_v29 }
 0x1a2   :  { %v529_v32 = vpack.c.bf16 %v521_v31, %v520_v30 }
 0x1a4   :  { %1641 = vmatmul.mubr.bf16.gmra.mxu1 %v529_v32 }
 0x234   :  { %v1630_v41 = vpop.f32.mrf.mxu1 }
 0x235   :  { %v644_v45 = vadd.f32 %v1630_v41, %v2102_v42 }
 0x236   :  { %v635_v43 = vpop.f32.mrf.mxu1 }
 0x237   :  { %v636_v44 = vadd.f32 %v2102_v42, %v635_v43  ;;  %v716_v52 = vmul.f32 0.2, %v644_v45  ;;  %vm700_vm10 = vcmp.gt.f32.partialorder %v644_v45, 0.0 }
 0x238   :  { %v1631_v46 = vpop.f32.mrf.mxu1 }
 0x239   :  { %v647_v47 = vadd.f32 %v1631_v46, %v2102_v42  ;;  %v714_v49 = vmul.f32 0.2, %v636_v44  ;;  %vm698_vm9 = vcmp.gt.f32.partialorder %v636_v44, 0.0  ;;  %v732_v57 = vsel %vm700_vm10, %v644_v45, %v716_v52  ;;  %v1793_v52 = vld [vmem:[%s2247_s7] sm:$0xff]  }
 0x23a   :  { %v638_v48 = vpop.f32.mrf.mxu1 }
 0x23b   :  { %vm701_vm8 = vcmp.gt.f32.partialorder %v647_v47, 0.0  ;;  %v717_v50 = vmul.f32 0.2, %v647_v47  ;;  %v639_v51 = vadd.f32 %v2102_v42, %v638_v48  ;;  %v730_v55 = vsel %vm698_vm9, %v636_v44, %v714_v49 }
 0x23d   :  { %vm699_vm11 = vcmp.gt.f32.partialorder %v639_v51, 0.0  ;;  %v715_v53 = vmul.f32 0.2, %v639_v51  ;;  %v733_v54 = vsel %vm701_vm8, %v647_v47, %v717_v50 }
 0x23e   :  { %v747_v59 = vpack.c.bf16 %v733_v54, %v732_v57  ;;  %v1795_v54 = vld [vmem:[%s2249_s9 + $0x30] sm:$0xff]   ;;  %v1798_v57 = vld [vmem:[%s2249_s9 + $0x18] sm:$0xff]  }
 0x23f   :  { %v731_v56 = vsel %vm699_vm11, %v639_v51, %v715_v53  ;;  %v1791_v51 = vld [vmem:[%s2247_s7 + $0x10] sm:$0xff]   ;;  %v1794_v53 = vld [vmem:[%s2249_s9 + $0x38] sm:$0xff]  }
 0x240   :  { %v746_v58 = vpack.c.bf16 %v731_v56, %v730_v55  ;;  %1686 = vmatprep.subr.bf16.mxu0 %v1791_v51  ;;  %1708 = vmatprep.subr.bf16.mxu1 %v1794_v53  ;;  %v1796_v55 = vld [vmem:[%s2249_s9 + $0x28] sm:$0xff]   ;;  %v1797_v56 = vld [vmem:[%s2249_s9 + $0x20] sm:$0xff]  }
 0x241   :  { %1687 = vmatpush3.bf16.msra.mxu0 %v1791_v51 }
 0x242   :  { %1660 = vmatprep.mubr.bf16.mxu1 %v746_v58 }
 0x243   :  { %1661 = vmatmul.mubr.bf16.vlgmr.msra.gmra.mxu1 %v747_v59  ;;  %v2147_v59 = vld [vmem:[%s2246_s6] ss:$0 sm:$0xff] }
 0x244   :  { %v1634_v60 = vpop.f32.mrf.mxu1  ;;  %1709 = vmatpush3.bf16.msra.mxu1 %v1794_v53 }
 0x245   :  { %v660_v63 = vadd.f32 %v1634_v60, %v2102_v42  ;;  %1710 = vmatprep.subr.bf16.mxu1 %v1795_v54 }
 0x246   :  { %v651_v61 = vpop.f32.mrf.mxu1 }
 0x247   :  { %v652_v62 = vadd.f32 %v2102_v42, %v651_v61  ;;  %v720_v6 = vmul.f32 0.2, %v660_v63  ;;  %vm704_vm14 = vcmp.gt.f32.partialorder %v660_v63, 0.0 }
 0x248   :  { %v1635_v0 = vpop.f32.mrf.mxu1  ;;  %1711 = vmatpush3.bf16.msra.mxu1 %v1795_v54 }
 0x249   :  { %v663_v1 = vadd.f32 %v1635_v0, %v2102_v42  ;;  %v718_v3 = vmul.f32 0.2, %v652_v62  ;;  %vm702_vm13 = vcmp.gt.f32.partialorder %v652_v62, 0.0  ;;  %v736_v12 = vsel %vm704_vm14, %v660_v63, %v720_v6  ;;  %1712 = vmatprep.subr.bf16.mxu1 %v1796_v55 }
 0x24a   :  { %v654_v2 = vpop.f32.mrf.mxu1 }
 0x24b   :  { %vm705_vm12 = vcmp.gt.f32.partialorder %v663_v1, 0.0  ;;  %v721_v4 = vmul.f32 0.2, %v663_v1  ;;  %v655_v5 = vadd.f32 %v2102_v42, %v654_v2  ;;  %v734_v9 = vsel %vm702_vm13, %v652_v62, %v718_v3 }
 0x24c   :  { %1713 = vmatpush3.bf16.msra.mxu1 %v1796_v55 }
 0x24d   :  { %vm703_vm15 = vcmp.gt.f32.partialorder %v655_v5, 0.0  ;;  %v719_v7 = vmul.f32 0.2, %v655_v5  ;;  %v737_v8 = vsel %vm705_vm12, %v663_v1, %v721_v4  ;;  %1714 = vmatprep.subr.bf16.mxu1 %v1797_v56 }
 0x24e   :  { %v749_v13 = vpack.c.bf16 %v737_v8, %v736_v12 }
 0x24f   :  { %v735_v10 = vsel %vm703_vm15, %v655_v5, %v719_v7 }
 0x250   :  { %v748_v11 = vpack.c.bf16 %v735_v10, %v734_v9  ;;  %1715 = vmatpush3.bf16.msra.mxu1 %v1797_v56 }
 0x251   :  { %1716 = vmatprep.subr.bf16.mxu1 %v1798_v57 }
 0x252   :  { %1664 = vmatprep.mubr.bf16.mxu1 %v748_v11 }
 0x253   :  { %1665 = vmatmul.mubr.bf16.gmra.mxu1 %v749_v13 }
 0x254   :  { %v1638_v14 = vpop.f32.mrf.mxu1  ;;  %1717 = vmatpush3.bf16.msra.mxu1 %v1798_v57 }
 0x255   :  { %v676_v17 = vadd.f32 %v1638_v14, %v2102_v42 }
 0x256   :  { %v667_v15 = vpop.f32.mrf.mxu1 }
 0x257   :  { %v668_v16 = vadd.f32 %v2102_v42, %v667_v15  ;;  %v724_v24 = vmul.f32 0.2, %v676_v17  ;;  %vm708_vm2 = vcmp.gt.f32.partialorder %v676_v17, 0.0 }
 0x258   :  { %v1639_v18 = vpop.f32.mrf.mxu1 }
 0x259   :  { %v679_v19 = vadd.f32 %v1639_v18, %v2102_v42  ;;  %v722_v21 = vmul.f32 0.2, %v668_v16  ;;  %vm706_vm1 = vcmp.gt.f32.partialorder %v668_v16, 0.0  ;;  %v740_v30 = vsel %vm708_vm2, %v676_v17, %v724_v24 }
 0x25a   :  { %v670_v20 = vpop.f32.mrf.mxu1 }
 0x25b   :  { %vm709_vm0 = vcmp.gt.f32.partialorder %v679_v19, 0.0  ;;  %v725_v22 = vmul.f32 0.2, %v679_v19  ;;  %v671_v23 = vadd.f32 %v2102_v42, %v670_v20  ;;  %v738_v27 = vsel %vm706_vm1, %v668_v16, %v722_v21 }
 0x25d   :  { %vm707_vm3 = vcmp.gt.f32.partialorder %v671_v23, 0.0  ;;  %v723_v25 = vmul.f32 0.2, %v671_v23  ;;  %v741_v26 = vsel %vm709_vm0, %v679_v19, %v725_v22 }
 0x25e   :  { %v751_v31 = vpack.c.bf16 %v741_v26, %v740_v30 }
 0x25f   :  { %v739_v28 = vsel %vm707_vm3, %v671_v23, %v723_v25 }
 0x260   :  { %v750_v29 = vpack.c.bf16 %v739_v28, %v738_v27 }
 0x262   :  { %1668 = vmatprep.mubr.bf16.mxu1 %v750_v29 }
 0x263   :  { %1669 = vmatmul.mubr.bf16.gmra.mxu1 %v751_v31 }
 0x264   :  { %v1642_v32 = vpop.f32.mrf.mxu1 }
 0x265   :  { %v692_v35 = vadd.f32 %v1642_v32, %v2102_v42 }
 0x266   :  { %v683_v33 = vpop.f32.mrf.mxu1 }
 0x267   :  { %v684_v34 = vadd.f32 %v2102_v42, %v683_v33  ;;  %v728_v43 = vmul.f32 0.2, %v692_v35  ;;  %vm712_vm6 = vcmp.gt.f32.partialorder %v692_v35, 0.0 }
 0x268   :  { %v1643_v36 = vpop.f32.mrf.mxu1 }
 0x269   :  { %v695_v37 = vadd.f32 %v1643_v36, %v2102_v42  ;;  %v726_v39 = vmul.f32 0.2, %v684_v34  ;;  %vm710_vm5 = vcmp.gt.f32.partialorder %v684_v34, 0.0  ;;  %v744_v49 = vsel %vm712_vm6, %v692_v35, %v728_v43 }
 0x26a   :  { %v686_v38 = vpop.f32.mrf.mxu1 }
 0x26b   :  { %vm713_vm4 = vcmp.gt.f32.partialorder %v695_v37, 0.0  ;;  %v729_v40 = vmul.f32 0.2, %v695_v37  ;;  %v687_v41 = vadd.f32 %v2102_v42, %v686_v38  ;;  %v742_v46 = vsel %vm710_vm5, %v684_v34, %v726_v39  ;;  %v1792_v42 = vld [vmem:[%s2247_s7 + $0x8] sm:$0xff]  }
 0x26c   :  { %1688 = vmatprep.subr.bf16.mxu0 %v1792_v42 }
 0x26d   :  { %vm711_vm7 = vcmp.gt.f32.partialorder %v687_v41, 0.0  ;;  %v727_v44 = vmul.f32 0.2, %v687_v41  ;;  %v745_v45 = vsel %vm713_vm4, %v695_v37, %v729_v40  ;;  %1689 = vmatpush3.bf16.msra.mxu0 %v1792_v42 }
 0x26e   :  { %v753_v50 = vpack.c.bf16 %v745_v45, %v744_v49  ;;  %1690 = vmatprep.subr.bf16.mxu0 %v1793_v52 }
 0x26f   :  { %v743_v47 = vsel %vm711_vm7, %v687_v41, %v727_v44 }
 0x270   :  { %v752_v48 = vpack.c.bf16 %v743_v47, %v742_v46 }
 0x271   :  { %1691 = vmatpush3.bf16.msra.mxu0 %v1793_v52 }
 0x272   :  { %1672 = vmatprep.mubr.bf16.mxu1 %v752_v48 }
 0x273   :  { %1673 = vmatmul.mubr.bf16.gmra.mxu1 %v753_v50 }
 0x303   :  { %v1662_v58 = vpop.f32.mrf.mxu1 }
 0x304   :  { %v868_v62 = vadd.f32 %v1662_v58, %v2147_v59 }
 0x305   :  { %v859_v60 = vpop.f32.mrf.mxu1 }
 0x306   :  { %v860_v61 = vadd.f32 %v2147_v59, %v859_v60  ;;  %v940_v5 = vmul.f32 0.2, %v868_v62  ;;  %vm924_vm10 = vcmp.gt.f32.partialorder %v868_v62, 0.0 }
 0x307   :  { %v1663_v63 = vpop.f32.mrf.mxu1 }
 0x308   :  { %v871_v0 = vadd.f32 %v1663_v63, %v2147_v59  ;;  %v938_v2 = vmul.f32 0.2, %v860_v61  ;;  %vm922_vm9 = vcmp.gt.f32.partialorder %v860_v61, 0.0  ;;  %v956_v10 = vsel %vm924_vm10, %v868_v62, %v940_v5  ;;  %v1801_v5 = vld [vmem:[%s2249_s9] sm:$0xff]  }
 0x309   :  { %v862_v1 = vpop.f32.mrf.mxu1 }
 0x30a   :  { %vm925_vm8 = vcmp.gt.f32.partialorder %v871_v0, 0.0  ;;  %v941_v3 = vmul.f32 0.2, %v871_v0  ;;  %v863_v4 = vadd.f32 %v2147_v59, %v862_v1  ;;  %v954_v8 = vsel %vm922_vm9, %v860_v61, %v938_v2 }
 0x30c   :  { %vm923_vm11 = vcmp.gt.f32.partialorder %v863_v4, 0.0  ;;  %v939_v6 = vmul.f32 0.2, %v863_v4  ;;  %v957_v7 = vsel %vm925_vm8, %v871_v0, %v941_v3 }
 0x30d   :  { %v971_v12 = vpack.c.bf16 %v957_v7, %v956_v10  ;;  %v2174_v7 = vld [vmem:[#allocation2] ss:$0 sm:$0xff] }
 0x30e   :  { %v955_v9 = vsel %vm923_vm11, %v863_v4, %v939_v6  ;;  %v1799_v4 = vld [vmem:[%s2249_s9 + $0x10] sm:$0xff]  }
 0x30f   :  { %v970_v11 = vpack.c.bf16 %v955_v9, %v954_v8  ;;  %1718 = vmatprep.subr.bf16.mxu1 %v1799_v4 }
 0x310   :  { %1719 = vmatpush3.bf16.msra.mxu1 %v1799_v4 }
 0x311   :  { %1692 = vmatprep.mubr.bf16.mxu0 %v970_v11 }
 0x312   :  { %1693 = vmatmul.mubr.bf16.vlgmr.msra.gmra.mxu0 %v971_v12 }
 0x313   :  { %v1666_v13 = vpop.f32.mrf.mxu1 }
 0x314   :  { %v884_v16 = vadd.f32 %v1666_v13, %v2147_v59 }
 0x315   :  { %v875_v14 = vpop.f32.mrf.mxu1 }
 0x316   :  { %v876_v15 = vadd.f32 %v2147_v59, %v875_v14  ;;  %v944_v23 = vmul.f32 0.2, %v884_v16  ;;  %vm928_vm14 = vcmp.gt.f32.partialorder %v884_v16, 0.0 }
 0x317   :  { %v1667_v17 = vpop.f32.mrf.mxu1 }
 0x318   :  { %v887_v18 = vadd.f32 %v1667_v17, %v2147_v59  ;;  %v942_v20 = vmul.f32 0.2, %v876_v15  ;;  %vm926_vm13 = vcmp.gt.f32.partialorder %v876_v15, 0.0  ;;  %v960_v29 = vsel %vm928_vm14, %v884_v16, %v944_v23 }
 0x319   :  { %v878_v19 = vpop.f32.mrf.mxu1 }
 0x31a   :  { %vm929_vm12 = vcmp.gt.f32.partialorder %v887_v18, 0.0  ;;  %v945_v21 = vmul.f32 0.2, %v887_v18  ;;  %v879_v22 = vadd.f32 %v2147_v59, %v878_v19  ;;  %v958_v26 = vsel %vm926_vm13, %v876_v15, %v942_v20 }
 0x31c   :  { %vm927_vm15 = vcmp.gt.f32.partialorder %v879_v22, 0.0  ;;  %v943_v24 = vmul.f32 0.2, %v879_v22  ;;  %v961_v25 = vsel %vm929_vm12, %v887_v18, %v945_v21 }
 0x31d   :  { %v973_v30 = vpack.c.bf16 %v961_v25, %v960_v29 }
 0x31e   :  { %v959_v27 = vsel %vm927_vm15, %v879_v22, %v943_v24 }
 0x31f   :  { %v972_v28 = vpack.c.bf16 %v959_v27, %v958_v26 }
 0x321   :  { %1696 = vmatprep.mubr.bf16.mxu0 %v972_v28 }
 0x322   :  { %1697 = vmatmul.mubr.bf16.gmra.mxu0 %v973_v30 }
 0x323   :  { %v1670_v31 = vpop.f32.mrf.mxu1 }
 0x324   :  { %v900_v34 = vadd.f32 %v1670_v31, %v2147_v59 }
 0x325   :  { %v891_v32 = vpop.f32.mrf.mxu1 }
 0x326   :  { %v892_v33 = vadd.f32 %v2147_v59, %v891_v32  ;;  %v948_v41 = vmul.f32 0.2, %v900_v34  ;;  %vm932_vm2 = vcmp.gt.f32.partialorder %v900_v34, 0.0 }
 0x327   :  { %v1671_v35 = vpop.f32.mrf.mxu1 }
 0x328   :  { %v903_v36 = vadd.f32 %v1671_v35, %v2147_v59  ;;  %v946_v38 = vmul.f32 0.2, %v892_v33  ;;  %vm930_vm1 = vcmp.gt.f32.partialorder %v892_v33, 0.0  ;;  %v964_v48 = vsel %vm932_vm2, %v900_v34, %v948_v41 }
 0x329   :  { %v894_v37 = vpop.f32.mrf.mxu1 }
 0x32a   :  { %vm933_vm0 = vcmp.gt.f32.partialorder %v903_v36, 0.0  ;;  %v949_v39 = vmul.f32 0.2, %v903_v36  ;;  %v895_v40 = vadd.f32 %v2147_v59, %v894_v37  ;;  %v962_v45 = vsel %vm930_vm1, %v892_v33, %v946_v38 }
 0x32c   :  { %vm931_vm3 = vcmp.gt.f32.partialorder %v895_v40, 0.0  ;;  %v947_v43 = vmul.f32 0.2, %v895_v40  ;;  %v965_v44 = vsel %vm933_vm0, %v903_v36, %v949_v39 }
 0x32d   :  { %v975_v49 = vpack.c.bf16 %v965_v44, %v964_v48 }
 0x32e   :  { %v963_v46 = vsel %vm931_vm3, %v895_v40, %v947_v43 }
 0x32f   :  { %v974_v47 = vpack.c.bf16 %v963_v46, %v962_v45 }
 0x331   :  { %1700 = vmatprep.mubr.bf16.mxu0 %v974_v47 }
 0x332   :  { %1701 = vmatmul.mubr.bf16.gmra.mxu0 %v975_v49 }
 0x333   :  { %v1674_v50 = vpop.f32.mrf.mxu1 }
 0x334   :  { %v916_v52 = vadd.f32 %v1674_v50, %v2147_v59 }
 0x335   :  { %v907_v51 = vpop.f32.mrf.mxu1 }
 0x336   :  { %v908_v42 = vadd.f32 %v2147_v59, %v907_v51  ;;  %v952_v60 = vmul.f32 0.2, %v916_v52  ;;  %vm936_vm6 = vcmp.gt.f32.partialorder %v916_v52, 0.0 }
 0x337   :  { %v1675_v53 = vpop.f32.mrf.mxu1 }
 0x338   :  { %v919_v54 = vadd.f32 %v1675_v53, %v2147_v59  ;;  %v950_v56 = vmul.f32 0.2, %v908_v42  ;;  %vm934_vm5 = vcmp.gt.f32.partialorder %v908_v42, 0.0  ;;  %v968_v2 = vsel %vm936_vm6, %v916_v52, %v952_v60 }
 0x339   :  { %v910_v55 = vpop.f32.mrf.mxu1 }
 0x33a   :  { %vm937_vm4 = vcmp.gt.f32.partialorder %v919_v54, 0.0  ;;  %v953_v57 = vmul.f32 0.2, %v919_v54  ;;  %v911_v58 = vadd.f32 %v2147_v59, %v910_v55  ;;  %v966_v63 = vsel %vm934_vm5, %v908_v42, %v950_v56  ;;  %v1800_v59 = vld [vmem:[%s2249_s9 + $0x8] sm:$0xff]  }
 0x33b   :  { %1720 = vmatprep.subr.bf16.mxu1 %v1800_v59 }
 0x33c   :  { %vm935_vm7 = vcmp.gt.f32.partialorder %v911_v58, 0.0  ;;  %v951_v61 = vmul.f32 0.2, %v911_v58  ;;  %v969_v62 = vsel %vm937_vm4, %v919_v54, %v953_v57  ;;  %1721 = vmatpush3.bf16.msra.mxu1 %v1800_v59 }
 0x33d   :  { %v977_v3 = vpack.c.bf16 %v969_v62, %v968_v2  ;;  %1722 = vmatprep.subr.bf16.mxu1 %v1801_v5 }
 0x33e   :  { %v967_v0 = vsel %vm935_vm7, %v911_v58, %v951_v61 }
 0x33f   :  { %v976_v1 = vpack.c.bf16 %v967_v0, %v966_v63 }
 0x340   :  { %1723 = vmatpush3.bf16.msra.mxu1 %v1801_v5 }
 0x341   :  { %1704 = vmatprep.mubr.bf16.mxu0 %v976_v1 }
 0x342   :  { %1705 = vmatmul.mubr.bf16.gmra.mxu0 %v977_v3 }
 0x3d2   :  { %v1694_v6 = vpop.f32.mrf.mxu0 }
 0x3d3   :  { %v1092_v10 = vadd.f32 %v1694_v6, %v2174_v7 }
 0x3d4   :  { %v1083_v8 = vpop.f32.mrf.mxu0 }
 0x3d5   :  { %v1084_v9 = vadd.f32 %v2174_v7, %v1083_v8  ;;  %v1164_v17 = vmul.f32 0.2, %v1092_v10  ;;  %vm1148_vm10 = vcmp.gt.f32.partialorder %v1092_v10, 0.0 }
 0x3d6   :  { %v1695_v11 = vpop.f32.mrf.mxu0 }
 0x3d7   :  { %v1095_v12 = vadd.f32 %v1695_v11, %v2174_v7  ;;  %v1162_v14 = vmul.f32 0.2, %v1084_v9  ;;  %vm1146_vm9 = vcmp.gt.f32.partialorder %v1084_v9, 0.0  ;;  %v1180_v22 = vsel %vm1148_vm10, %v1092_v10, %v1164_v17 }
 0x3d8   :  { %v1086_v13 = vpop.f32.mrf.mxu0 }
 0x3d9   :  { %vm1149_vm8 = vcmp.gt.f32.partialorder %v1095_v12, 0.0  ;;  %v1165_v15 = vmul.f32 0.2, %v1095_v12  ;;  %v1087_v16 = vadd.f32 %v2174_v7, %v1086_v13  ;;  %v1178_v20 = vsel %vm1146_vm9, %v1084_v9, %v1162_v14 }
 0x3db   :  { %vm1147_vm11 = vcmp.gt.f32.partialorder %v1087_v16, 0.0  ;;  %v1163_v18 = vmul.f32 0.2, %v1087_v16  ;;  %v1181_v19 = vsel %vm1149_vm8, %v1095_v12, %v1165_v15 }
 0x3dc   :  { %v1195_v24 = vpack.c.bf16 %v1181_v19, %v1180_v22 }
 0x3dd   :  { %v1179_v21 = vsel %vm1147_vm11, %v1087_v16, %v1163_v18  ;;  %v1475_v16 = vld [vmem:[#allocation4] ss:$0 sm:$0xff] }
 0x3de   :  { %v1194_v23 = vpack.c.bf16 %v1179_v21, %v1178_v20 }
 0x3e0   :  { %1724 = vmatprep.mubr.bf16.mxu1 %v1194_v23 }
 0x3e1   :  { %1725 = vmatmul.mubr.bf16.vlgmr.msra.gmra.mxu1 %v1195_v24 }
 0x3e2   :  { %v1698_v25 = vpop.f32.mrf.mxu0 }
 0x3e3   :  { %v1108_v28 = vadd.f32 %v1698_v25, %v2174_v7 }
 0x3e4   :  { %v1099_v26 = vpop.f32.mrf.mxu0 }
 0x3e5   :  { %v1100_v27 = vadd.f32 %v2174_v7, %v1099_v26  ;;  %v1168_v35 = vmul.f32 0.2, %v1108_v28  ;;  %vm1152_vm14 = vcmp.gt.f32.partialorder %v1108_v28, 0.0 }
 0x3e6   :  { %v1699_v29 = vpop.f32.mrf.mxu0 }
 0x3e7   :  { %v1111_v30 = vadd.f32 %v1699_v29, %v2174_v7  ;;  %v1166_v32 = vmul.f32 0.2, %v1100_v27  ;;  %vm1150_vm13 = vcmp.gt.f32.partialorder %v1100_v27, 0.0  ;;  %v1184_v41 = vsel %vm1152_vm14, %v1108_v28, %v1168_v35 }
 0x3e8   :  { %v1102_v31 = vpop.f32.mrf.mxu0 }
 0x3e9   :  { %vm1153_vm12 = vcmp.gt.f32.partialorder %v1111_v30, 0.0  ;;  %v1169_v33 = vmul.f32 0.2, %v1111_v30  ;;  %v1103_v34 = vadd.f32 %v2174_v7, %v1102_v31  ;;  %v1182_v38 = vsel %vm1150_vm13, %v1100_v27, %v1166_v32 }
 0x3eb   :  { %vm1151_vm15 = vcmp.gt.f32.partialorder %v1103_v34, 0.0  ;;  %v1167_v36 = vmul.f32 0.2, %v1103_v34  ;;  %v1185_v37 = vsel %vm1153_vm12, %v1111_v30, %v1169_v33 }
 0x3ec   :  { %v1197_v43 = vpack.c.bf16 %v1185_v37, %v1184_v41 }
 0x3ed   :  { %v1183_v39 = vsel %vm1151_vm15, %v1103_v34, %v1167_v36 }
 0x3ee   :  { %v1196_v40 = vpack.c.bf16 %v1183_v39, %v1182_v38 }
 0x3f0   :  { %1728 = vmatprep.mubr.bf16.mxu1 %v1196_v40 }
 0x3f1   :  { %1729 = vmatmul.mubr.bf16.gmra.mxu1 %v1197_v43 }
 0x3f2   :  { %v1702_v44 = vpop.f32.mrf.mxu0 }
 0x3f3   :  { %v1124_v47 = vadd.f32 %v1702_v44, %v2174_v7 }
 0x3f4   :  { %v1115_v45 = vpop.f32.mrf.mxu0 }
 0x3f5   :  { %v1116_v46 = vadd.f32 %v2174_v7, %v1115_v45  ;;  %v1172_v53 = vmul.f32 0.2, %v1124_v47  ;;  %vm1156_vm2 = vcmp.gt.f32.partialorder %v1124_v47, 0.0 }
 0x3f6   :  { %v1703_v48 = vpop.f32.mrf.mxu0 }
 0x3f7   :  { %v1127_v49 = vadd.f32 %v1703_v48, %v2174_v7  ;;  %v1170_v51 = vmul.f32 0.2, %v1116_v46  ;;  %vm1154_vm1 = vcmp.gt.f32.partialorder %v1116_v46, 0.0  ;;  %v1188_v60 = vsel %vm1156_vm2, %v1124_v47, %v1172_v53 }
 0x3f8   :  { %v1118_v50 = vpop.f32.mrf.mxu0 }
 0x3f9   :  { %vm1157_vm0 = vcmp.gt.f32.partialorder %v1127_v49, 0.0  ;;  %v1173_v42 = vmul.f32 0.2, %v1127_v49  ;;  %v1119_v52 = vadd.f32 %v2174_v7, %v1118_v50  ;;  %v1186_v56 = vsel %vm1154_vm1, %v1116_v46, %v1170_v51 }
 0x3fb   :  { %vm1155_vm3 = vcmp.gt.f32.partialorder %v1119_v52, 0.0  ;;  %v1171_v54 = vmul.f32 0.2, %v1119_v52  ;;  %v1189_v55 = vsel %vm1157_vm0, %v1127_v49, %v1173_v42 }
 0x3fc   :  { %v1199_v61 = vpack.c.bf16 %v1189_v55, %v1188_v60 }
 0x3fd   :  { %v1187_v57 = vsel %vm1155_vm3, %v1119_v52, %v1171_v54 }
 0x3fe   :  { %v1198_v58 = vpack.c.bf16 %v1187_v57, %v1186_v56 }
 0x400   :  { %1732 = vmatprep.mubr.bf16.mxu1 %v1198_v58 }
 0x401   :  { %1733 = vmatmul.mubr.bf16.gmra.mxu1 %v1199_v61 }
 0x402   :  { %v1706_v62 = vpop.f32.mrf.mxu0 }
 0x403   :  { %v1140_v1 = vadd.f32 %v1706_v62, %v2174_v7 }
 0x404   :  { %v1131_v63 = vpop.f32.mrf.mxu0 }
 0x405   :  { %v1132_v0 = vadd.f32 %v2174_v7, %v1131_v63  ;;  %v1176_v8 = vmul.f32 0.2, %v1140_v1  ;;  %vm1160_vm6 = vcmp.gt.f32.partialorder %v1140_v1, 0.0 }
 0x406   :  { %v1707_v2 = vpop.f32.mrf.mxu0 }
 0x407   :  { %v1143_v3 = vadd.f32 %v1707_v2, %v2174_v7  ;;  %v1174_v59 = vmul.f32 0.2, %v1132_v0  ;;  %vm1158_vm5 = vcmp.gt.f32.partialorder %v1132_v0, 0.0  ;;  %v1192_v14 = vsel %vm1160_vm6, %v1140_v1, %v1176_v8 }
 0x408   :  { %v1134_v4 = vpop.f32.mrf.mxu0 }
 0x409   :  { %vm1161_vm4 = vcmp.gt.f32.partialorder %v1143_v3, 0.0  ;;  %v1177_v5 = vmul.f32 0.2, %v1143_v3  ;;  %v1135_v6 = vadd.f32 %v2174_v7, %v1134_v4  ;;  %v1190_v11 = vsel %vm1158_vm5, %v1132_v0, %v1174_v59 }
 0x40b   :  { %vm1159_vm7 = vcmp.gt.f32.partialorder %v1135_v6, 0.0  ;;  %v1175_v9 = vmul.f32 0.2, %v1135_v6  ;;  %v1193_v10 = vsel %vm1161_vm4, %v1143_v3, %v1177_v5 }
 0x40c   :  { %v1201_v15 = vpack.c.bf16 %v1193_v10, %v1192_v14 }
 0x40d   :  { %v1191_v12 = vsel %vm1159_vm7, %v1135_v6, %v1175_v9 }
 0x40e   :  { %v1200_v13 = vpack.c.bf16 %v1191_v12, %v1190_v11 }
 0x410   :  { %1736 = vmatprep.mubr.bf16.mxu1 %v1200_v13 }
 0x411   :  { %1737 = vmatmul.mubr.bf16.gmra.mxu1 %v1201_v15 }
 0x4a1   :  { %v1726_v17 = vpop.f32.mrf.mxu1 }
 0x4a2   :  { %v1316_v18 = vadd.f32 %v1726_v17, %v1475_v16 }
 0x4a3   :  { %v1307_v19 = vpop.f32.mrf.mxu1 }
 0x4a4   :  { %1372 = vst [vmem:[%s2251_s11 + $0x10] sm:$0xff] %v1316_v18  ;;  %v1308_v7 = vadd.f32 %v1475_v16, %v1307_v19 }
 0x4a5   :  { %v1727_v20 = vpop.f32.mrf.mxu1 }
 0x4a6   :  { %1370 = vst [vmem:[%s2251_s11] sm:$0xff] %v1308_v7  ;;  %v1319_v21 = vadd.f32 %v1727_v20, %v1475_v16 }
 0x4a7   :  { %v1310_v22 = vpop.f32.mrf.mxu1 }
 0x4a8   :  { %1373 = vst [vmem:[%s2251_s11 + $0x18] sm:$0xff] %v1319_v21  ;;  %v1311_v23 = vadd.f32 %v1475_v16, %v1310_v22 }
 0x4aa   :  { %1371 = vst [vmem:[%s2251_s11 + $0x8] sm:$0xff] %v1311_v23 }
 0x4b1   :  { %v1730_v24 = vpop.f32.mrf.mxu1 }
 0x4b2   :  { %v1332_v25 = vadd.f32 %v1730_v24, %v1475_v16 }
 0x4b3   :  { %v1323_v26 = vpop.f32.mrf.mxu1 }
 0x4b4   :  { %1376 = vst [vmem:[%s2251_s11 + $0x30] sm:$0xff] %v1332_v25  ;;  %v1324_v27 = vadd.f32 %v1475_v16, %v1323_v26 }
 0x4b5   :  { %v1731_v28 = vpop.f32.mrf.mxu1 }
 0x4b6   :  { %1374 = vst [vmem:[%s2251_s11 + $0x20] sm:$0xff] %v1324_v27  ;;  %v1335_v29 = vadd.f32 %v1731_v28, %v1475_v16 }
 0x4b7   :  { %v1326_v30 = vpop.f32.mrf.mxu1 }
 0x4b8   :  { %1377 = vst [vmem:[%s2251_s11 + $0x38] sm:$0xff] %v1335_v29  ;;  %v1327_v31 = vadd.f32 %v1475_v16, %v1326_v30 }
 0x4ba   :  { %1375 = vst [vmem:[%s2251_s11 + $0x28] sm:$0xff] %v1327_v31 }
 0x4c1   :  { %v1734_v32 = vpop.f32.mrf.mxu1 }
 0x4c2   :  { %v1348_v33 = vadd.f32 %v1734_v32, %v1475_v16 }
 0x4c3   :  { %v1339_v34 = vpop.f32.mrf.mxu1 }
 0x4c4   :  { %1380 = vst [vmem:[%s2251_s11 + $0x50] sm:$0xff] %v1348_v33  ;;  %v1340_v35 = vadd.f32 %v1475_v16, %v1339_v34 }
 0x4c5   :  { %v1735_v36 = vpop.f32.mrf.mxu1 }
 0x4c6   :  { %1378 = vst [vmem:[%s2251_s11 + $0x40] sm:$0xff] %v1340_v35  ;;  %v1351_v37 = vadd.f32 %v1735_v36, %v1475_v16 }
 0x4c7   :  { %v1342_v38 = vpop.f32.mrf.mxu1 }
 0x4c8   :  { %1381 = vst [vmem:[%s2251_s11 + $0x58] sm:$0xff] %v1351_v37  ;;  %v1343_v39 = vadd.f32 %v1475_v16, %v1342_v38 }
 0x4ca   :  { %1379 = vst [vmem:[%s2251_s11 + $0x48] sm:$0xff] %v1343_v39 }
 0x4d1   :  { %v1738_v40 = vpop.f32.mrf.mxu1 }
 0x4d2   :  { %v1364_v41 = vadd.f32 %v1738_v40, %v1475_v16 }
 0x4d3   :  { %v1355_v43 = vpop.f32.mrf.mxu1 }
 0x4d4   :  { %1384 = vst [vmem:[%s2251_s11 + $0x70] sm:$0xff] %v1364_v41  ;;  %v1356_v44 = vadd.f32 %v1475_v16, %v1355_v43 }
 0x4d5   :  { %v1739_v45 = vpop.f32.mrf.mxu1 }
 0x4d6   :  { %1382 = vst [vmem:[%s2251_s11 + $0x60] sm:$0xff] %v1356_v44  ;;  %v1367_v46 = vadd.f32 %v1739_v45, %v1475_v16 }
 0x4d7   :  { %v1358_v47 = vpop.f32.mrf.mxu1 }
 0x4d8   :  { %1385 = vst [vmem:[%s2251_s11 + $0x78] sm:$0xff] %v1367_v46  ;;  %v1359_v48 = vadd.f32 %v1475_v16, %v1358_v47 }
 0x4da   :  { %1383 = vst [vmem:[%s2251_s11 + $0x68] sm:$0xff] %v1359_v48 }
 0x4db   :  { %1390 = vsyncpa [#allocation3], 1 }
 0x4dc   :  { %1391 = vsyncpa [#allocation5], 1 }

</bundles_post_ra>
